<compile_context>
chip_gen: v7x
topology: tpu7x:2x2x1
jax: 0.10.0
libtpu: 0.0.40
codegen_flags: <defaults>
</compile_context>

<pallas_src>
import functools
import math

import numpy as np
import jax
import jax.numpy as jnp
from jax.experimental import pallas as pl
from jax.experimental.pallas import tpu as pltpu


_LANE = 128
_FUSED_MAX_BATCH_F32_BYTES = 6 << 20   # above this per-batch slab, use tiled path


def _round_up(x, m):
    return ((x + m - 1) // m) * m


def _band_matrix(kconv, C):
    """(C, C) matrix M with M[ci, co] = kconv[ci - co + half]; conv = g @ M."""
    k = int(kconv.shape[0])
    half = (k - 1) // 2
    d = np.arange(C)[:, None] - np.arange(C)[None, :] + half      # (C, C) static
    valid = (d >= 0) & (d < k)
    idx = np.clip(d, 0, k - 1)
    return jnp.where(jnp.asarray(valid), kconv[idx], 0.0).astype(jnp.float32)


# ----------------------------- fused (small-slab) path -----------------------

def _fused_kernel(x_ref, w_ref, band_ref, o_ref, *, n_hw, padded):
    """One block = (bt, C, HWp): stats + channel conv + gated multiply."""
    n = float(n_hw)
    xf = x_ref[...].astype(jnp.float32)                        # (bt, C, HWp)

    # two-pass moments over the spatial (lane) axis
    mean = jnp.sum(xf, axis=2) * (1.0 / n)                     # (bt, C) lane reduce
    d = xf - mean[:, :, None]
    if padded:  # zero-padded lanes would contribute (0 - mean)^2 -- mask them
        lane = jax.lax.broadcasted_iota(jnp.int32, d.shape, 2)
        d = jnp.where(lane < n_hw, d, 0.0)
    # NOTE: H*W == 1 gives std == 0 here (PyTorch returns NaN for ddof=1).
    var = jnp.sum(d * d, axis=2) * (1.0 / max(n - 1.0, 1.0))   # (bt, C)
    std = jnp.sqrt(jnp.maximum(var, 0.0))

    g = 0.5 * (mean + std) + w_ref[0] * mean + w_ref[1] * std  # (bt, C)
    # channel conv as one (bt, C) x (C, C) dot -- lane-dense MXU output
    conv = jnp.dot(g, band_ref[...], preferred_element_type=jnp.float32)
    att = jax.nn.sigmoid(conv)                                 # (bt, C)

    # Re-read the block (already resident in the pipelined input buffer) so the
    # f32 slab dies before the store pass; multiply in x's dtype.
    att3 = att[:, :, None].astype(x_ref.dtype)                 # (bt, C, 1)
    o_ref[...] = (x_ref[...] * att3).astype(o_ref.dtype)


def _pick_block_batch(B, per_batch_bytes, target_bytes=4 << 20):
    """Largest divisor of B whose block fits ~target; prefer >= 4 grid steps
    (v7x: 2 TensorCores x steady-state double buffering), then >= 2, then any."""
    divisors = [d for d in range(1, B + 1) if B % d == 0]
    fits = [d for d in divisors if d * per_batch_bytes <= target_bytes] or [1]
    for min_steps in (4, 2, 1):
        pref = [d for d in fits if B // d >= min_steps]
        if pref:
            return max(pref)
    return max(fits)


def _mca_gate_fused(x2, w, band, HW):
    B, C, _ = x2.shape
    HWp = _round_up(HW, _LANE)
    padded = HWp != HW
    if padded:
        x2 = jnp.pad(x2, ((0, 0), (0, 0), (0, HWp - HW)))      # lane-dense stores

    bt = _pick_block_batch(B, C * HWp * 4)
    grid = (B // bt,)

    block_in = bt * C * HWp * x2.dtype.itemsize
    block_f32 = bt * C * HWp * 4
    est = 4 * block_in + 3 * block_f32 + 2 * C * C * 4 + (2 << 20)
    vmem_limit = int(min(32 << 20, max(16 << 20, est)))        # 32 MiB: v7x-safe

    out = pl.pallas_call(
        functools.partial(_fused_kernel, n_hw=HW, padded=padded),
        out_shape=jax.ShapeDtypeStruct((B, C, HWp), x2.dtype),
        grid=grid,
        in_specs=[
            pl.BlockSpec((bt, C, HWp), lambda b: (b, 0, 0)),
            pl.BlockSpec(memory_space=pltpu.MemorySpace.SMEM),
            pl.BlockSpec((C, C), lambda b: (0, 0)),            # band: loaded once
        ],
        out_specs=pl.BlockSpec((bt, C, HWp), lambda b: (b, 0, 0)),
        compiler_params=pltpu.CompilerParams(
            dimension_semantics=("parallel",),
            vmem_limit_bytes=vmem_limit,
        ),
    )(x2, w, band)
    # TODO(synk): input_output_aliases={0: 0} would save the output HBM
    # allocation but silently donates the caller's x; left off.
    return out[:, :, :HW] if padded else out


# ----------------------------- tiled (large-slab) path -----------------------

def _att_kernel(x_ref, w_ref, band_ref, o_ref, s_acc, q_acc, *, n_hw):
    """Grid (B, n_spatial_tiles): accumulate sum/sumsq, emit att at last tile."""
    si = pl.program_id(1)

    @pl.when(si == 0)
    def _():
        s_acc[...] = jnp.zeros_like(s_acc)
        q_acc[...] = jnp.zeros_like(q_acc)

    xf = x_ref[...].astype(jnp.float32)                        # (1, C, t_hw)
    s_acc[...] += jnp.sum(xf, axis=2)                          # (1, C)
    q_acc[...] += jnp.sum(xf * xf, axis=2)

    @pl.when(si == pl.num_programs(1) - 1)
    def _():
        n = float(n_hw)
        mean = s_acc[...] * (1.0 / n)
        # TODO(synk): single-pass variance can cancel when |mean| >> std; a
        # streaming centered (Welford) update would match torch more closely.
        var = (q_acc[...] - n * mean * mean) * (1.0 / max(n - 1.0, 1.0))
        std = jnp.sqrt(jnp.maximum(var, 0.0))
        g = 0.5 * (mean + std) + w_ref[0] * mean + w_ref[1] * std   # (1, C)
        conv = jnp.dot(g, band_ref[...], preferred_element_type=jnp.float32)
        o_ref[...] = jax.nn.sigmoid(conv)[:, :, None]               # (1, C, 1)


def _apply_kernel(x_ref, att_ref, o_ref):
    att = att_ref[...].astype(x_ref.dtype)                     # (1, C, 1)
    o_ref[...] = (x_ref[...] * att).astype(o_ref.dtype)


def _spatial_tile(C, HWp, override=None, target_bytes=2 << 20):
    if override is not None:
        assert override % _LANE == 0 and HWp % override == 0
        return int(override)
    m = HWp // _LANE
    t_max = max(1, (target_bytes // (C * 4)) // _LANE)         # units of 128 lanes
    best = 1
    for d in range(1, m + 1):
        if m % d == 0 and d <= t_max:
            best = d
    return _LANE * best


def _mca_gate_tiled(x2, w, band, HW, tile_hw=None):
    B, C, _ = x2.shape
    HWp = _round_up(HW, _LANE)
    t_hw = _spatial_tile(C, HWp, tile_hw)
    if HWp != HW:
        x2 = jnp.pad(x2, ((0, 0), (0, 0), (0, HWp - HW)))      # zeros: sums unaffected
    ns = HWp // t_hw

    att = pl.pallas_call(
        functools.partial(_att_kernel, n_hw=HW),
        out_shape=jax.ShapeDtypeStruct((B, C, 1), jnp.float32),
        grid=(B, ns),
        in_specs=[
            pl.BlockSpec((1, C, t_hw), lambda b, s: (b, 0, s)),
            pl.BlockSpec(memory_space=pltpu.MemorySpace.SMEM),
            pl.BlockSpec((C, C), lambda b, s: (0, 0)),
        ],
        out_specs=pl.BlockSpec((1, C, 1), lambda b, s: (b, 0, 0)),
        scratch_shapes=[pltpu.VMEM((1, C), jnp.float32),
                        pltpu.VMEM((1, C), jnp.float32)],
        compiler_params=pltpu.CompilerParams(
            dimension_semantics=("parallel", "arbitrary"),
            vmem_limit_bytes=32 << 20,
        ),
    )(x2, w, band)

    out = pl.pallas_call(
        _apply_kernel,
        out_shape=jax.ShapeDtypeStruct((B, C, HWp), x2.dtype),
        grid=(B, ns),
        in_specs=[
            pl.BlockSpec((1, C, t_hw), lambda b, s: (b, 0, s)),
            pl.BlockSpec((1, C, 1), lambda b, s: (b, 0, 0)),
        ],
        out_specs=pl.BlockSpec((1, C, t_hw), lambda b, s: (b, 0, s)),
        compiler_params=pltpu.CompilerParams(
            dimension_semantics=("parallel", "parallel"),
            vmem_limit_bytes=32 << 20,
        ),
    )(x2, att)
    return out[:, :, :HW] if HWp != HW else out


# ----------------------------- public wrapper --------------------------------

def mca_gate(x, params, *, force_tiled=False, tile_hw=None):
    """MCAGate forward. x: (B, C, H, W)."""
    B, C, H, W = x.shape
    HW = H * W
    k_size = int(np.prod(params["conv"].shape))

    # glue: sigmoid of the 2-element pool-mixing weights; banded conv matrix
    w = jax.nn.sigmoid(params["weight"]).astype(jnp.float32)        # (2,)
    kconv = params["conv"].reshape(k_size).astype(jnp.float32)      # (k,)
    band = _band_matrix(kconv, C)                                   # (C, C)

    x2 = x.reshape(B, C, HW)              # contiguous merge -> lane-dense last dim
    if force_tiled or C * HW * 4 > _FUSED_MAX_BATCH_F32_BYTES:
        out2 = _mca_gate_tiled(x2, w, band, HW, tile_hw=tile_hw)
    else:
        out2 = _mca_gate_fused(x2, w, band, HW)
    return out2.reshape(B, C, H, W)


# ----------------------------- reference & test ------------------------------

def mca_gate_ref(x, params):
    """Pure-JAX reference replicating the PyTorch MCAGate exactly."""
    b, c, h, w = x.shape
    k_size = int(np.prod(params["conv"].shape))
    half = (k_size - 1) // 2

    avg = jnp.mean(x, axis=(2, 3), keepdims=True)                       # (b,c,1,1)
    std = jnp.std(x.reshape(b, c, -1), axis=2, ddof=1).reshape(b, c, 1, 1)
    wt = jax.nn.sigmoid(params["weight"])
    out = 0.5 * (avg + std) + wt[0] * avg + wt[1] * std                 # (b,c,1,1)

    v = out[:, :, 0, 0]                                                 # (b, c)
    kk = params["conv"].reshape(k_size)
    vp = jnp.pad(v, ((0, 0), (half, half)))
    conv = sum(kk[j] * vp[:, j:j + c] for j in range(k_size))           # (b, c)
    att = jax.nn.sigmoid(conv)[:, :, None, None]
    return x * att


def init_params(key, k_size):
    k1, k2 = jax.random.split(key)
    bound = 1.0 / math.sqrt(k_size)   # Conv2d(1,1,(1,k)) kaiming-uniform bound
    return {
        "weight": jax.random.uniform(k1, (2,), jnp.float32),            # torch.rand(2)
        "conv": jax.random.uniform(k2, (1, 1, 1, k_size), jnp.float32, -bound, bound),
    }


if __name__ == "__main__":
    key = jax.random.PRNGKey(0)
    kx, kp = jax.random.split(key)

    B, C, H, W = 2, 4, 16, 16
    k_size = 3
    x = jax.random.normal(kx, (B, C, H, W), jnp.float32)
    params = init_params(kp, k_size)
    ref = jax.block_until_ready(mca_gate_ref(x, params))

    # fused (single pallas_call) path
    out = jax.block_until_ready(mca_gate(x, params))
    np.testing.assert_allclose(np.asarray(out), np.asarray(ref), rtol=1e-4, atol=2e-5)

    # tiled (spatial-reduction two-kernel) path, forced with 2 spatial tiles
    out_t = jax.block_until_ready(mca_gate(x, params, force_tiled=True, tile_hw=128))
    np.testing.assert_allclose(np.asarray(out_t), np.asarray(ref), rtol=2e-4, atol=1e-4)

    # non-multiple-of-128 spatial size exercises the lane-padding guard
    B2, C2, H2, W2 = 2, 8, 7, 7
    xb = jax.random.normal(kx, (B2, C2, H2, W2), jnp.float32)
    out_b = jax.block_until_ready(mca_gate(xb, params))
    ref_b = jax.block_until_ready(mca_gate_ref(xb, params))
    np.testing.assert_allclose(np.asarray(out_b), np.asarray(ref_b), rtol=1e-4, atol=2e-5)

    print("KERNEL_OK")
</pallas_src>

<mosaic_0001>
module attributes {stable_mosaic.version = 11 : i64} {
  func.func @_fused_kernel(%arg0: i32, %arg1: memref<1x4x256xf32, #tpu.memory_space<vmem>>, %arg2: memref<2xf32, #tpu.memory_space<smem>>, %arg3: memref<4x4xf32, #tpu.memory_space<vmem>>, %arg4: memref<1x4x256xf32, #tpu.memory_space<vmem>>) attributes {dimension_semantics = [#tpu.dimension_semantics<parallel>], iteration_bounds = array<i64: 2>, scalar_prefetch = 0 : i64, scratch_operands = 0 : i64, tpu.core_type = #tpu.core_type<tc>, window_params = [{transform_indices = @transform_0, window_bounds = array<i64: 1, 4, 256>}, {transform_indices = @transform_1, window_bounds = array<i64: 2>}, {pipeline_mode = #tpu.pipeline_mode<synchronous>, transform_indices = @transform_2, window_bounds = array<i64: 4, 4>}, {transform_indices = @transform_3, window_bounds = array<i64: 1, 4, 256>}]} {
    %c0 = arith.constant 0 : index
    %c0_0 = arith.constant 0 : index
    %c0_1 = arith.constant 0 : index
    %0 = vector.load %arg1[%c0, %c0_0, %c0_1] : memref<1x4x256xf32, #tpu.memory_space<vmem>>, vector<1x4x256xf32>
    %cst = arith.constant dense<0.000000e+00> : vector<1x4xf32>
    %1 = vector.multi_reduction <add>, %0, %cst [2] : vector<1x4x256xf32> to vector<1x4xf32>
    %cst_2 = arith.constant 3.906250e-03 : f32
    %2 = vector.broadcast %cst_2 : f32 to vector<1x4xf32>
    %3 = arith.mulf %1, %2 : vector<1x4xf32>
    %4 = vector.shape_cast %3 : vector<1x4xf32> to vector<1x4x1xf32>
    %5 = vector.broadcast %4 : vector<1x4x1xf32> to vector<1x4x256xf32>
    %6 = arith.subf %0, %5 : vector<1x4x256xf32>
    %7 = arith.mulf %6, %6 : vector<1x4x256xf32>
    %cst_3 = arith.constant dense<0.000000e+00> : vector<1x4xf32>
    %8 = vector.multi_reduction <add>, %7, %cst_3 [2] : vector<1x4x256xf32> to vector<1x4xf32>
    %cst_4 = arith.constant 0.00392156886 : f32
    %9 = vector.broadcast %cst_4 : f32 to vector<1x4xf32>
    %10 = arith.mulf %8, %9 : vector<1x4xf32>
    %cst_5 = arith.constant 0.000000e+00 : f32
    %11 = vector.broadcast %cst_5 : f32 to vector<1x4xf32>
    %12 = arith.maximumf %10, %11 : vector<1x4xf32>
    %13 = math.sqrt %12 : vector<1x4xf32>
    %14 = arith.addf %3, %13 : vector<1x4xf32>
    %cst_6 = arith.constant 5.000000e-01 : f32
    %15 = vector.broadcast %cst_6 : f32 to vector<1x4xf32>
    %16 = arith.mulf %15, %14 : vector<1x4xf32>
    %c0_7 = arith.constant 0 : index
    %17 = memref.load %arg2[%c0_7] : memref<2xf32, #tpu.memory_space<smem>>
    %18 = vector.broadcast %17 : f32 to vector<1x4xf32>
    %19 = arith.mulf %18, %3 : vector<1x4xf32>
    %20 = arith.addf %16, %19 : vector<1x4xf32>
    %c1 = arith.constant 1 : index
    %21 = memref.load %arg2[%c1] : memref<2xf32, #tpu.memory_space<smem>>
    %22 = vector.broadcast %21 : f32 to vector<1x4xf32>
    %23 = arith.mulf %22, %13 : vector<1x4xf32>
    %24 = arith.addf %20, %23 : vector<1x4xf32>
    %c0_8 = arith.constant 0 : index
    %c0_9 = arith.constant 0 : index
    %25 = vector.load %arg3[%c0_8, %c0_9] : memref<4x4xf32, #tpu.memory_space<vmem>>, vector<4x4xf32>
    %cst_10 = arith.constant dense<0.000000e+00> : vector<1x4xf32>
    %26 = tpu.matmul %24, %25, %cst_10 {dimension_numbers = #tpu.dot_dimension_numbers<[1], [0], [0], [1], [0, 0, 1, 1], [], []>} : vector<1x4xf32>, vector<4x4xf32>, vector<1x4xf32> -> vector<1x4xf32>
    %27 = arith.negf %26 : vector<1x4xf32>
    %28 = math.exp %27 : vector<1x4xf32>
    %cst_11 = arith.constant 1.000000e+00 : f32
    %29 = vector.broadcast %cst_11 : f32 to vector<1x4xf32>
    %30 = arith.addf %29, %28 : vector<1x4xf32>
    %31 = arith.divf %29, %30 : vector<1x4xf32>
    %32 = vector.shape_cast %31 : vector<1x4xf32> to vector<1x4x1xf32>
    %c0_12 = arith.constant 0 : index
    %c0_13 = arith.constant 0 : index
    %c0_14 = arith.constant 0 : index
    %33 = vector.load %arg1[%c0_12, %c0_13, %c0_14] : memref<1x4x256xf32, #tpu.memory_space<vmem>>, vector<1x4x256xf32>
    %34 = vector.broadcast %32 : vector<1x4x1xf32> to vector<1x4x256xf32>
    %35 = arith.mulf %33, %34 : vector<1x4x256xf32>
    %c0_15 = arith.constant 0 : index
    %c0_16 = arith.constant 0 : index
    %c0_17 = arith.constant 0 : index
    %36 = vector.load %arg4[%c0_15, %c0_16, %c0_17] : memref<1x4x256xf32, #tpu.memory_space<vmem>>, vector<1x4x256xf32>
    tpu.vector_store %arg4[%c0_15, %c0_16, %c0_17], %35 {strides = array<i32>} : memref<1x4x256xf32, #tpu.memory_space<vmem>>, vector<1x4x256xf32>,
    return
  }
  func.func @transform_0(%arg0: i32) -> (i32, i32, i32) {
    %c0_i32 = arith.constant 0 : i32
    %c0_i32_0 = arith.constant 0 : i32
    %c0_i32_1 = arith.constant 0 : i32
    return %arg0, %c0_i32, %c0_i32_0 : i32, i32, i32
  }
  func.func @transform_1(%arg0: i32) -> i32 {
    %c0_i32 = arith.constant 0 : i32
    %c0_i32_0 = arith.constant 0 : i32
    return %c0_i32 : i32
  }
  func.func @transform_2(%arg0: i32) -> (i32, i32) {
    %c0_i32 = arith.constant 0 : i32
    %c0_i32_0 = arith.constant 0 : i32
    %c0_i32_1 = arith.constant 0 : i32
    return %c0_i32, %c0_i32_0 : i32, i32
  }
  func.func @transform_3(%arg0: i32) -> (i32, i32, i32) {
    %c0_i32 = arith.constant 0 : i32
    %c0_i32_0 = arith.constant 0 : i32
    %c0_i32_1 = arith.constant 0 : i32
    return %arg0, %c0_i32, %c0_i32_0 : i32, i32, i32
  }
}

</mosaic_0001>

<bundles_post_ra>
// kernel: tpu_custom_call.1
= control target key start
LH: loop header
LB: loop body
LE: loop exit
PB: predicated region body
PF: predicated region fallthrough
CT: control target
= control target key end

     0   :  { %8 = vsyncpa [#allocation3], 0  ;;  %s905_s0 = inlined_call_operand.hbm [shape: f32[2,4,256], index: 0, kind: input, shape index: {}]   ;;  %s906_s1 = inlined_call_operand.vmem [shape: f32[2], index: 1, kind: input, shape index: {}]   ;;  %s907_s2 = inlined_call_operand.vmem [shape: f32[4,4], index: 2, kind: input, shape index: {}]   ;;  %s908_s3 = inlined_call_operand.hbm [shape: f32[2,4,256], index: 3, kind: output, shape index: {}]  }
   0x1   :  { %10 = vsyncpa [#allocation3 + $0x1], 0 }
   0x2   :  { %11 = vsyncpa [#allocation5], 0 }
   0x3   :  { %12 = vsyncpa [#allocation4], 0 }
   0x4   :  { %14 = vsyncpa [#allocation4 + $0x1], 0  ;;  %s694_s12 = smov 0   ;;  %s696_s13 = smov 0  }
   0x5   :  { %s698_s14 = smov 0   ;;  %s700_s15 = smov 0  }
   0x6 LB: > { %s715_s16 = sadd.s32 4294967295, %s666_s15   ;;  %s455_s17 = sadd.s32 4294967294, %s666_s15   ;;  %s666_s15 = sphi %s700_s15, %s929_s15   ;;  %s662_s14 = sphi %s698_s14, %s928_s14   ;;  %s658_s13 = sphi %s696_s13, %s927_s13   ;;  %s654_s12 = sphi %s694_s12, %s926_s12  }
   0x7   : > { %p40_p0 = scmp.ne.s32.totalorder %s658_s13, %s654_s12  ;;  %p909_p1 = scmp.eq.s32.totalorder %s715_s16, 0 }
   0x8   : > { %p112_p3 = scmp.eq.s32.totalorder %s455_s17, 1  ;;  %p456_p5 = scmp.ge.s32.totalorder %s666_s15, 1 }
   0x9   : > { %p724_p4 = por %p909_p1, %p40_p0  ;;  %p119_p7 = scmp.lt.s32.totalorder %s666_s15, 3 }
   0xa   : > { %p729_p6 = por %p112_p3, %p40_p0  ;;  %s132_s22 = sshll.u32 %s906_s1, 4  ;;  %s133_s22 = int_to_ptr.vmem [resolvable:$true] %s132_s22 }
   0xb   : > { %s912_s18 = scalar_select %p724_p4, 1, 0 }
   0xc   : > { %s913_s19 = scalar_select %p729_p6, 1, 0 }
   0xd   : > { %p737_p8 = pnand %p456_p5, %p119_p7  ;;  %s745_s24 = sadd.s32 1, %s666_s15  }
   0xe   : > { %s24_s26 = ssub.s32 %s666_s15, %s745_s24  ;;  %s27_s28 = sadd.s32 1, %s662_s14 }
   0xf   : > { %p492_p10 = pneg %p737_p8  ;;  %p755_p12 = scmp.eq.s32.totalorder %s24_s26, 0 }
  0x10   : > { %p34_p13 = scmp.ne.s32.totalorder %s662_s14, %s658_s13  ;;  %s551_s29 = scalar_lea.vmem %s133_s22, 16 }
  0x11   : > { %p749_p11 = pnand %p492_p10, %p909_p1  ;;  %p552_p0 = scmp.ne.s32.totalorder %s133_s22, %s551_s29 }
  0x12   : > { %p559_p9 = scmp.lt.s32.totalorder %s133_s22, %s133_s22  ;;  %p560_p2 = scmp.lt.s32.totalorder %s551_s29, %s551_s29 }
  0x13   : > { %p553_p3 = pneg %p749_p11 }
  0x14   : > { %p561_p10 = por %p560_p2, %p559_p9 }
  0x15   : > { %p554_p5 = pnand %p553_p3, %p552_p0 }
  0x17   : > { %p555_p7 = pneg %p554_p5 }
  0x19   : > { %p562_p1 = pnand %p561_p10, %p555_p7 }
  0x1b   : > { %565 = shalt.err (!%p562_p1)
}
  0x1c   : > { %s668_s30 = smov [#allocation6]   ;;  %p35_p2 = scmp.eq.s32.totalorder %s666_s15, 0 }
  0x1d   : > { %495 = dma.vmem_to_smem (!%p749_p11), %s133_s22, 16, %s668_s30, [#allocation5]  }
  0x1e   : > { %s769_s4 = scalar_select %p755_p12, %s662_s14, %s27_s28  }
  0x1f   : > { %p917_p1 = scmp.eq.s32.totalorder %s715_s16, 1  ;;  %p505_p0 = scmp.lt.s32.totalorder %s666_s15, 2 }
  0x20   : > { %s146_s6 = sand.u32 1, %s662_s14   ;;  %p36_p3 = por %p35_p2, %p34_p13 }
  0x21   : > { %p777_p9 = por %p917_p1, %p34_p13  ;;  %s459_s7 = sshll.u32 %s146_s6, 3 }
  0x22   : > { %s475_s8 = sshll.u32 %s666_s15, 7  ;;  %s150_s17 = scalar_lea.vmem [#allocation2], %s459_s7 }
  0x23   : > { %s918_s5 = scalar_select %p777_p9, 1, 0 }
  0x24   : > { %s790_s11 = scalar_lea.hbm %s905_s0, %s475_s8  ;;  %s158_s20 = sshll.u32 %s150_s17, 4  ;;  %s796_s20 = int_to_ptr.vmem [resolvable:$true] %s158_s20 }
  0x25   : > { %p792_p11 = pnand %p505_p0, %p36_p3  ;;  %s147_s22 = scalar_lea.sflag [#allocation3], %s146_s6 }
  0x26   : > { %s566_s25 = scalar_lea.hbm %s790_s11, 128  ;;  %s571_s28 = scalar_lea.hbm %s905_s0, 256 }
  0x27   : > { %p567_p12 = scmp.ne.s32.totalorder %s790_s11, %s566_s25  ;;  %p568_p13 = pneg %p792_p11 }
  0x28   : > { %p572_p10 = scmp.lt.u32.totalorder %s790_s11, %s905_s0  ;;  %p573_p2 = scmp.lt.u32.totalorder %s571_s28, %s566_s25 }
  0x29   : > { %p569_p5 = pnand %p568_p13, %p567_p12  ;;  %p575_p0 = scmp.lt.u32.totalorder %s566_s25, %s790_s11 }
  0x2a   : > { %p574_p1 = por %p573_p2, %p572_p10 }
  0x2b   : > { %p570_p7 = pneg %p569_p5 }
  0x2c   : > { %p576_p3 = por %p575_p0, %p574_p1 }
  0x2e   : > { %p577_p6 = pnand %p576_p3, %p570_p7 }
  0x30   : > { %580 = shalt.err (!%p577_p6)
}
  0x31   : > { %s581_s6 = scalar_lea.vmem %s796_s20, 128  ;;  %s669_s7 = smov [#allocation2]  }
  0x32   : > { %p582_p12 = scmp.ne.s32.totalorder %s796_s20, %s581_s6  ;;  %s586_s8 = sshll.u32 %s669_s7, 4  ;;  %s587_s8 = int_to_ptr.vmem [resolvable:$false] %s586_s8 }
  0x33   : > { %s588_s9 = scalar_lea.vmem %s587_s8, 256  ;;  %p589_p4 = scmp.lt.s32.totalorder %s796_s20, %s587_s8 }
  0x34   : > { %p584_p5 = pnand %p582_p12, %p568_p13  ;;  %p590_p10 = scmp.lt.s32.totalorder %s588_s9, %s581_s6 }
  0x36   : > { %p585_p9 = pneg %p584_p5  ;;  %p591_p2 = por %p590_p10, %p589_p4 }
  0x38   : > { %p592_p1 = pnand %p591_p2, %p585_p9 }
  0x3a   : > { %595 = shalt.err (!%p592_p1)
}
  0x3b   : > { %499 = dma.hbm_to_vmem [thread:$0]  (!%p792_p11), %s790_s11, 128, %s796_s20, %s147_s22  }
  0x3c   : > { %167 = sbr.rel (%p737_p8) target bundleno = 779 (0x30b), region = 32  ;;  %s826_s10 = sand.u32 (!%p737_p8), 1, %s658_s13  }
  0x3d   : > { %s463_s17 = sshll.u32 (!%p737_p8), %s826_s10, 3  ;;  %s170_s25 = scalar_lea.sflag (!%p737_p8), [#allocation3], %s826_s10 }
  0x3e   : > { %s173_s26 = scalar_lea.vmem (!%p737_p8), [#allocation2], %s463_s17  ;;  %p920_p4 = scmp.ne.s32.totalorder (!%p737_p8), %s912_s18, 0 }
  0x43   : > { %641 = dma.done.wait (%p920_p4), %s170_s25, 128  }
  0x44   : > { %643 = vsyncadd (%p920_p4), %s170_s25, 4294967168  ;;  %p921_p6 = scmp.eq.s32.totalorder %s715_s16, 0 }
  0x46   : > { %645 = dma.done.wait (%p921_p6), [#allocation5], 16   ;;  %p922_p8 = pmov %p921_p6 }
  0x48   : > { %647 = vsyncadd (%p922_p8), [#allocation5], 4294967280 }
  0x49   : > { %182 = sfence }
  0x4a   : > { %v840_v0 = vld [vmem:[%s173_s26] sm:$0xff]  ;;  %vm205_vm0 = vcmask 1043456   ;;  %v670_v5 = vmov 839922192   ;;  %v216_v7 = vlaneseq  ;;  %v671_v21 = vmov 0.0   ;;  %s242_s11 = sld [smem:[#allocation6]] }
  0x4b   : > { %v203_v1 = vcombine.high %v840_v0, %v840_v0  ;;  %v206_v2 = vsel %vm205_vm0, %v840_v0, 0.0  ;;  %v214_v6 = vunpack.c.l.s4 %v670_v5  ;;  %v250_v20 = vld [vmem:[%s907_s2] sm:$0xf]  ;;  %479 = vmatprep.subr.mxu0 %v671_v21  ;;  %vm672_vm1 = vmmov 0   ;;  %s466_s20 = sld [smem:[#allocation6 + $0x1]]  ;;  %s476_s21 = sshll.u32 %s715_s16, 7 }
  0x4c   : > { %v217_v9 = vshrl.u32 %v216_v7, 7  ;;  %481 = vmatprep.mubr.msk.f32.mxu0 %vm672_vm1, %v671_v21  ;;  %480 = vmatpush3.msk.msra.mxu0 %vm205_vm0, %v250_v20  ;;  %v253_v32 = vand.u32 127, %v216_v7  ;;  %vm258_vm4 = vcmask 31744   ;;  %s200_s22 = scalar_lea.vmem [#allocation7], %s463_s17  ;;  %s861_s30 = scalar_lea.hbm %s908_s3, %s476_s21 }
  0x4d   : > { %v207_v3 = vsel %vm205_vm0, %v203_v1, 0.0  ;;  %v215_v8 = vunpack.c.0.s8 %v214_v6  ;;  %s373_s27 = sshll.u32 %s200_s22, 4  ;;  %s359_s6 = scalar_lea.sflag [#allocation4], %s826_s10  ;;  %s863_s27 = int_to_ptr.vmem [resolvable:$true] %s373_s27 }
  0x4e   : > { %v208_v4 = vadd.f32 %v207_v3, %v206_v2  ;;  %v256_v38 = vsub.s32 %v253_v32, %v217_v9  ;;  %v342_v46 = vsub.s32 0, %v217_v9  ;;  %s596_s7 = scalar_lea.vmem %s863_s27, 128  ;;  %p923_p11 = scmp.ne.s32.totalorder %s918_s5, 0 }
  0x4f   : > { %v218_v10 = vsub.s32 %v215_v8, %v217_v9  ;;  %p597_p9 = scmp.ne.s32.totalorder %s863_s27, %s596_s7  ;;  %s673_s16 = smov [#allocation7]  }
  0x50   : > { %209 = vadd.xlane.f32.xlu0 %v208_v4  ;;  %v243_v29 = vstv %s242_s11  ;;  %s600_s8 = sshll.u32 %s673_s16, 4  ;;  %s601_s8 = int_to_ptr.vmem [resolvable:$false] %s600_s8 }
  0x51   : > { %v247_v33 = vstv %s466_s20  ;;  %p598_p13 = pnand %p597_p9, %p923_p11  ;;  %s602_s9 = scalar_lea.vmem %s601_s8, 256 }
  0x52   : > { %p603_p0 = scmp.lt.s32.totalorder %s863_s27, %s601_s8  ;;  %p604_p3 = scmp.lt.s32.totalorder %s602_s9, %s596_s7 }
  0x53   : > { %p599_p7 = pneg %p598_p13 }
  0x54   : > { %p605_p12 = por %p604_p3, %p603_p0 }
  0x56   : > { %p606_p5 = pnand %p605_p12, %p599_p7 }
  0xdd   : > { %v210_v11 = vpop.xlane.xlu0 %209 }
  0xde   : > { %v211_v12 = vmul.f32 0.00390625, %v210_v11 }
  0xe0   : > { %v219_v13 = vrot.slane %v211_v12, %v218_v10  ;;  %v244_v34 = vmul.f32 %v243_v29, %v211_v12 }
  0xe2   : > { %v221_v14 = vsub.f32 %v840_v0, %v219_v13 }
  0xe4   : > { %v222_v15 = vmul.f32 %v221_v14, %v221_v14 }
  0xe6   : > { %v224_v16 = vcombine.high %v222_v15, %v222_v15  ;;  %v226_v17 = vsel %vm205_vm0, %v222_v15, 0.0 }
  0xe8   : > { %v227_v18 = vsel %vm205_vm0, %v224_v16, 0.0 }
  0xe9   : > { %v228_v19 = vadd.f32 %v227_v18, %v226_v17 }
  0xeb   : > { %229 = vadd.xlane.f32.xlu0 %v228_v19 }
 0x178   : > { %v230_v22 = vpop.xlane.xlu0 %229 }
 0x179   : > { %v231_v23 = vmul.f32 0.003921569, %v230_v22 }
 0x17b   : > { %v232_v24 = vmax.f32 %v231_v23, 0.0 }
 0x17d   : > { %545 = vrsqrt.f32 %v232_v24  ;;  %vm235_vm2 = vcmp.eq.f32.partialorder %v232_v24, inf  ;;  %v238_v27 = vand.u32 2147483648, %v232_v24  ;;  %vm237_vm3 = vcmp.eq.f32.partialorder %v232_v24, 0.0 }
 0x187   : > { %v546_v25 = vpop.eup %545 }
 0x188   : > { %v234_v26 = vmul.f32 %v546_v25, %v232_v24 }
 0x18a   : > { %v236_v28 = vsel %vm235_vm2, %v232_v24, %v234_v26 }
 0x18b   : > { %v239_v30 = vsel %vm237_vm3, %v238_v27, %v236_v28 }
 0x18c   : > { %v240_v31 = vadd.f32 %v239_v30, %v211_v12  ;;  %v248_v37 = vmul.f32 %v247_v33, %v239_v30 }
 0x18e   : > { %v241_v35 = vmul.f32 0.5, %v240_v31 }
 0x190   : > { %v245_v36 = vadd.f32 %v244_v34, %v241_v35 }
 0x192   : > { %v249_v39 = vadd.f32 %v248_v37, %v245_v36 }
 0x194   : > { %v257_v40 = vrot.slane %v249_v39, %v256_v38 }
 0x196   : > { %482 = vmatmul.mubr.msk.f32.vlgmr.msra.gmra.mrb[0].mxu0 %vm258_vm4, %v257_v40 }
 0x269   : > { %v330_v41 = vpop.f32.mrb[0].mxu0 }
 0x26a   : > { %v469_v42 = vmul.f32 -1.442695, %v330_v41  ;;  %v483_v43 = vpop.f32.mrb[1].mxu0 }
 0x26c   : > { %547 = vpow2.f32 %v469_v42 }
 0x276   : > { %v548_v44 = vpop.eup %547 }
 0x277   : > { %v337_v45 = vadd.f32 1.0, %v548_v44 }
 0x279   : > { %549 = vrcp.f32 %v337_v45 }
 0x283   : > { %v550_v47 = vpop.eup %549 }
 0x284   : > { %v343_v48 = vrot.slane %v550_v47, %v342_v46 }
 0x286   : > { %345 = vbcast.lane.b32.xlu1 %v343_v48, 256 }
 0x2f8   : > { %v346_v49 = vpop.permute.xlu1 %345 }
 0x2f9   : > { %v354_v50 = vrot.slane %v346_v49, %v218_v10 }
 0x2fb   : > { %v356_v51 = vmul.f32 %v354_v50, %v840_v0 }
 0x2fd   : > { %357 = vst [vmem:[%s200_s22] sm:$0xff] %v356_v51 }
 0x2fe   : > { %609 = shalt.err (!%p606_p5)
}
 0x2ff   : > { %s610_s10 = scalar_lea.hbm %s861_s30, 128  ;;  %s614_s26 = scalar_lea.hbm %s908_s3, 256 }
 0x300   : > { %p611_p10 = scmp.ne.s32.totalorder %s861_s30, %s610_s10  ;;  %p615_p4 = scmp.lt.u32.totalorder %s861_s30, %s908_s3 }
 0x301   : > { %p616_p6 = scmp.lt.u32.totalorder %s614_s26, %s610_s10  ;;  %p618_p9 = scmp.lt.u32.totalorder %s610_s10, %s861_s30 }
 0x302   : > { %p612_p2 = pnand %p611_p10, %p923_p11 }
 0x303   : > { %p617_p8 = por %p616_p6, %p615_p4 }
 0x304   : > { %p613_p1 = pneg %p612_p2 }
 0x305   : > { %p619_p13 = por %p618_p9, %p617_p8 }
 0x307   : > { %p620_p7 = pnand %p619_p13, %p613_p1 }
 0x309   : > { %623 = shalt.err (!%p620_p7)
}
 0x30a   : > { %490 = dma.vmem_to_hbm [thread:$0]  (%p923_p11), %s863_s27, 128, %s861_s30, %s359_s6  }
 0x30b PF: > { %s385_s11 = sand.u32 1, %s654_s12   ;;  %p924_p0 = scmp.ne.s32.totalorder %s913_s19, 0 }
 0x30c   : > { %p925_p3 = scmp.ge.s32.totalorder %s666_s15, 2  ;;  %s386_s20 = scalar_lea.sflag [#allocation4], %s385_s11 }
 0x30e   : > { %p501_p12 = pnand %p925_p3, %p924_p0 }
 0x310   : > { %649 = dma.done.wait (!%p501_p12), %s386_s20, 128  }
 0x311   : > { %651 = vsyncadd (!%p501_p12), %s386_s20, 4294967168  ;;  %p17_p5 = scmp.ge.s32.totalorder %s745_s24, 4   ;;  %s926_s12 = smov %s658_s13 }
 0x312   : > { %s927_s13 = smov %s662_s14  ;;  %s928_s14 = smov %s769_s4 }
 0x313   : > { %s929_s15 = smov %s745_s24  ;;  %19 = sbr.rel (!%p17_p5) target bundleno = 6 (0x6), region = 82 }
 0x31a   :  { %391 = vsyncpa [#allocation3], 1 }
 0x31b   :  { %393 = vsyncpa [#allocation3 + $0x1], 1 }
 0x31c   :  { %394 = vsyncpa [#allocation4], 1 }
 0x31d   :  { %396 = vsyncpa [#allocation4 + $0x1], 1 }
 0x31e   :  { %397 = vsyncpa [#allocation5], 1 }
 0x31f   :  { %399 = vsyncpa [#allocation5 + $0x1], 1 }

</bundles_post_ra>
